<compile_context>
chip_gen: v6e
topology: v6e:2x2x1
jax: 0.10.0
libtpu: 0.0.40
codegen_flags: <defaults>
</compile_context>

<pallas_src>
import jax
import jax.numpy as jnp
from jax.experimental import pallas as pl
from jax.experimental.pallas import tpu as pltpu


def _round_up(n, m):
    return ((n + m - 1) // m) * m


def _lr_kernel(x_ref, w_ref, b_ref, o_ref):
    # (TB, D) @ (D, C) on the MXU, f32 accumulate, + bias broadcast.
    o_ref[...] = (
        jnp.dot(x_ref[...], w_ref[...], preferred_element_type=jnp.float32)
        + b_ref[...]
    )


def logistic_regression_forward(x, gamma, beta, running_mean, running_var,
                                weight, bias, *, block_b=16384, eps=1e-5):
    """x: (B, D) f32, weight: (C, D) f32 (PyTorch layout), bias: (C,) f32."""
    x = x.astype(jnp.float32)
    B, D = x.shape
    C = weight.shape[0]

    # ---- Fold eval-mode BatchNorm into the linear layer (f32, one-time cost).
    s = gamma.astype(jnp.float32) / jnp.sqrt(running_var.astype(jnp.float32) + eps)  # (D,)
    w_folded = (weight.astype(jnp.float32) * s[None, :]).T                           # (D, C)
    b_folded = bias.astype(jnp.float32) + (
        (beta.astype(jnp.float32) - running_mean.astype(jnp.float32) * s)
        @ weight.astype(jnp.float32).T
    )                                                                                 # (C,)
    b_folded = b_folded.reshape(1, C)

    # ---- Batch tiling: TB multiple of 8 (f32 sublane), pad B to grid multiple.
    # block_b default 16384: large enough to amortize per-step overhead on
    # v5e/v6e, and (with the lane-padded VMEM accounting below) still fits
    # v7x's smaller VMEM.
    TB = min(block_b, _round_up(B, 8))
    B_pad = _round_up(B, TB)
    if B_pad != B:
        x = jnp.pad(x, ((0, B_pad - B), (0, 0)))
    grid = (B_pad // TB,)

    # ---- VMEM budget with physical (8,128) lane padding.
    # Each f32 block physically occupies ceil(rows/8)*8 x ceil(cols/128)*128.
    def _phys_bytes(rows, cols):
        return _round_up(rows, 8) * _round_up(cols, 128) * 4

    x_buf = _phys_bytes(TB, D)      # (TB, 32) -> TB x 128 lanes
    o_buf = _phys_bytes(TB, C)      # (TB, 4)  -> TB x 128 lanes
    w_buf = _phys_bytes(D, C)       # tiny, resident
    b_buf = _phys_bytes(1, C)       # tiny, resident
    tile_bytes = 2 * (x_buf + o_buf + w_buf + b_buf)   # double-buffered streams
    # ~25% headroom, capped well below v7x's 64 MiB physical VMEM.
    vmem_limit = min(48 * 1024 * 1024, max(int(tile_bytes * 1.25), 4 * 1024 * 1024))

    cost = pl.CostEstimate(
        flops=2 * B_pad * D * C,
        bytes_accessed=(B_pad * D + D * C + C + B_pad * C) * 4,
        transcendentals=0,
    )

    out_padded = pl.pallas_call(
        _lr_kernel,
        out_shape=jax.ShapeDtypeStruct((B_pad, C), jnp.float32),
        grid=grid,
        in_specs=[
            pl.BlockSpec((TB, D), lambda i: (i, 0)),   # x tile (pipelined)
            pl.BlockSpec((D, C), lambda i: (0, 0)),    # folded weight (resident)
            pl.BlockSpec((1, C), lambda i: (0, 0)),    # folded bias (resident)
        ],
        out_specs=pl.BlockSpec((TB, C), lambda i: (i, 0)),
        compiler_params=pltpu.CompilerParams(
            dimension_semantics=("parallel",),
            vmem_limit_bytes=vmem_limit,
        ),
        cost_estimate=cost,
    )(x, w_folded, b_folded)

    return out_padded[:B]


if __name__ == "__main__":
    B, D, C = 8, 32, 4  # batch, input_dim, num_classes

    key = jax.random.PRNGKey(0)
    kx, kw, kb, km, kv = jax.random.split(key, 5)

    x = jax.random.normal(kx, (B, D), dtype=jnp.float32)

    # Deterministic synthetic parameters (shapes from LogisticRegression.__init__)
    gamma = jnp.ones((D,), jnp.float32)                         # bn.weight
    beta = jnp.zeros((D,), jnp.float32)                         # bn.bias
    running_mean = 0.1 * jax.random.normal(km, (D,), jnp.float32)
    running_var = 1.0 + 0.1 * jnp.abs(jax.random.normal(kv, (D,), jnp.float32))
    weight = 0.05 * jax.random.normal(kw, (C, D), jnp.float32)  # linear.weight (C, D)
    bias = 0.05 * jax.random.normal(kb, (C,), jnp.float32)      # linear.bias (C,)

    out = logistic_regression_forward(x, gamma, beta, running_mean, running_var, weight, bias)
    out = jax.block_until_ready(out)

    # Pure-JAX reference check (eval-mode BN + Linear; dropout is identity).
    eps = 1e-5
    x_hat = (x - running_mean) / jnp.sqrt(running_var + eps) * gamma + beta
    ref = x_hat @ weight.T + bias
    assert out.shape == (B, C)
    assert jnp.allclose(out, ref, atol=1e-5, rtol=1e-5), "mismatch vs reference"

    print("KERNEL_OK")
</pallas_src>

<mosaic_0001>
module attributes {stable_mosaic.version = 11 : i64} {
  func.func @_lr_kernel(%arg0: i32, %arg1: memref<8x32xf32, #tpu.memory_space<vmem>>, %arg2: memref<32x4xf32, #tpu.memory_space<vmem>>, %arg3: memref<1x4xf32, #tpu.memory_space<vmem>>, %arg4: memref<8x4xf32, #tpu.memory_space<vmem>>) attributes {dimension_semantics = [#tpu.dimension_semantics<parallel>], iteration_bounds = array<i64: 1>, scalar_prefetch = 0 : i64, scratch_operands = 0 : i64, tpu.core_type = #tpu.core_type<tc>, window_params = [{transform_indices = @transform_0, window_bounds = array<i64: 8, 32>}, {pipeline_mode = #tpu.pipeline_mode<synchronous>, transform_indices = @transform_1, window_bounds = array<i64: 32, 4>}, {pipeline_mode = #tpu.pipeline_mode<synchronous>, transform_indices = @transform_2, window_bounds = array<i64: 1, 4>}, {transform_indices = @transform_3, window_bounds = array<i64: 8, 4>}]} {
    %c0 = arith.constant 0 : index
    %c0_0 = arith.constant 0 : index
    %0 = vector.load %arg1[%c0, %c0_0] : memref<8x32xf32, #tpu.memory_space<vmem>>, vector<8x32xf32>
    %c0_1 = arith.constant 0 : index
    %c0_2 = arith.constant 0 : index
    %1 = vector.load %arg2[%c0_1, %c0_2] : memref<32x4xf32, #tpu.memory_space<vmem>>, vector<32x4xf32>
    %cst = arith.constant dense<0.000000e+00> : vector<8x4xf32>
    %2 = tpu.matmul %0, %1, %cst {dimension_numbers = #tpu.dot_dimension_numbers<[1], [0], [0], [1], [0, 0, 1, 1], [], []>} : vector<8x32xf32>, vector<32x4xf32>, vector<8x4xf32> -> vector<8x4xf32>
    %c0_3 = arith.constant 0 : index
    %c0_4 = arith.constant 0 : index
    %3 = vector.load %arg3[%c0_3, %c0_4] : memref<1x4xf32, #tpu.memory_space<vmem>>, vector<1x4xf32>
    %4 = vector.broadcast %3 : vector<1x4xf32> to vector<8x4xf32>
    %5 = arith.addf %2, %4 : vector<8x4xf32>
    %c0_5 = arith.constant 0 : index
    %c0_6 = arith.constant 0 : index
    %6 = vector.load %arg4[%c0_5, %c0_6] : memref<8x4xf32, #tpu.memory_space<vmem>>, vector<8x4xf32>
    tpu.vector_store %arg4[%c0_5, %c0_6], %5 {strides = array<i32>} : memref<8x4xf32, #tpu.memory_space<vmem>>, vector<8x4xf32>,
    return
  }
  func.func @transform_0(%arg0: i32) -> (i32, i32) {
    %c0_i32 = arith.constant 0 : i32
    %c0_i32_0 = arith.constant 0 : i32
    return %arg0, %c0_i32 : i32, i32
  }
  func.func @transform_1(%arg0: i32) -> (i32, i32) {
    %c0_i32 = arith.constant 0 : i32
    %c0_i32_0 = arith.constant 0 : i32
    %c0_i32_1 = arith.constant 0 : i32
    return %c0_i32, %c0_i32_0 : i32, i32
  }
  func.func @transform_2(%arg0: i32) -> (i32, i32) {
    %c0_i32 = arith.constant 0 : i32
    %c0_i32_0 = arith.constant 0 : i32
    %c0_i32_1 = arith.constant 0 : i32
    return %c0_i32, %c0_i32_0 : i32, i32
  }
  func.func @transform_3(%arg0: i32) -> (i32, i32) {
    %c0_i32 = arith.constant 0 : i32
    %c0_i32_0 = arith.constant 0 : i32
    return %arg0, %c0_i32 : i32, i32
  }
}

</mosaic_0001>

<bundles_post_ra>
// kernel: tpu_custom_call.1
= control target key start
LH: loop header
LB: loop body
LE: loop exit
PB: predicated region body
PF: predicated region fallthrough
CT: control target
= control target key end

     0   :  { %v126_v0 = vmov 0.0   ;;  %vm127_vm0 = vmmov 0   ;;  %vm26_vm1 = vcmask 261120   ;;  %vm100_vm2 = vcmask 31744   ;;  %s169_s1 = inlined_call_operand.vmem [shape: f32[32,4], index: 1, kind: input, shape index: {}]   ;;  %s170_s0 = inlined_call_operand.vmem [shape: f32[8,32], index: 0, kind: input, shape index: {}]   ;;  %s171_s2 = inlined_call_operand.vmem [shape: f32[1,4], index: 2, kind: input, shape index: {}]   ;;  %s172_s3 = inlined_call_operand.vmem [shape: f32[8,4], index: 3, kind: output, shape index: {}]  }
   0x1   :  { %113 = vmatprep.subr.mxu0 %v126_v0  ;;  %v18_v1 = vld [vmem:[%s169_s1 + $0x18] sm:$0xff]  ;;  %v17_v2 = vld [vmem:[%s169_s1 + $0x10] sm:$0xff]  ;;  %121 = vmatprep.mubr.msk.f32.mxu0 %vm127_vm0, %v126_v0  ;;  %v16_v3 = vld [vmem:[%s169_s1 + $0x8] sm:$0xff] }
   0x2   :  { %114 = vmatpush3.msra.mxu0 %v18_v1  ;;  %v15_v4 = vld [vmem:[%s169_s1] sm:$0xff] }
   0x3   :  { %115 = vmatprep.subr.mxu0 %v126_v0  ;;  %v14_v5 = vld [vmem:[%s170_s0] sm:$0xff] }
   0x4   :  { %116 = vmatpush3.msra.mxu0 %v17_v2  ;;  %v106_v6 = vld [vmem:[%s171_s2] ss:$0 sm:$0xff] }
   0x5   :  { %117 = vmatprep.subr.mxu0 %v126_v0 }
   0x6   :  { %118 = vmatpush3.msra.mxu0 %v16_v3 }
   0x7   :  { %119 = vmatprep.subr.mxu0 %v126_v0 }
   0x8   :  { %120 = vmatpush3.msra.mxu0 %v15_v4 }
   0x9   :  { %122 = vmatmul.mubr.msk.f32.vlgmr.msra.gmra.mxu0 %vm26_vm1, %v14_v5 }
  0xc9   :  { %v96_v7 = vpop.f32.mrf.mxu0 }
  0xca   :  { %v97_v8 = vadd.f32 %v106_v6, %v96_v7 }
  0xcb   :  { %v123_v9 = vpop.f32.mrf.mxu0 }
  0xcc   :  { %101 = vst.msk [vmem:[%s172_s3] sm:$0xff] %vm100_vm2, %v97_v8 }

</bundles_post_ra>
